<compile_context>
chip_gen: v7x
topology: tpu7x:2x2x1
jax: 0.10.0
libtpu: 0.0.40
codegen_flags: <defaults>
</compile_context>

<pallas_src>
import functools

import jax
import jax.numpy as jnp
from jax.experimental import pallas as pl
from jax.experimental.pallas import tpu as pltpu

LANES = 128
_MAX_BLOCK_ROWS = 1024     # (1024, 128) f32 tile = 512 KiB / input / buffer (fits every
                           # generation's scoped-VMEM default with double buffering)
_NUM_PARTITIONS = 2        # leading "parallel" grid axis (2 TensorCores on v7x)
_PAD_LOGIT = -1e9          # padded tail: x = -1e9, t = 0  ->  exactly zero contribution


def _cdiv(a, b):
    return -(-a // b)


def _round_up(x, m):
    return _cdiv(x, m) * m


def _focal_loss_kernel(x_ref, t_ref, out_ref, *, alpha, gamma):
    """Process one (1, block_rows, 128) tile; accumulate per-lane partial sums."""

    @pl.when(pl.program_id(1) == 0)
    def _():
        out_ref[...] = jnp.zeros_like(out_ref)

    x = x_ref[...].astype(jnp.float32)
    t = t_ref[...].astype(jnp.float32)

    # z = x for t==0, -x for t==1.  Numerically stable BCE-with-logits:
    #   bce = relu(z) + log1p(exp(-|x|))   (== F.binary_cross_entropy_with_logits)
    # Reuse s = exp(-|x|) so pt = exp(-bce) = where(z>0, s, 1) / (1+s): one fewer exp
    # per element (EUP is the saturating slot on v7x at 3.2 TB/s HBM).
    z = (1.0 - 2.0 * t) * x
    s = jnp.exp(-jnp.abs(x))
    bce = jnp.maximum(z, 0.0) + jnp.log1p(s)
    pt = jnp.where(z > 0.0, s, 1.0) / (1.0 + s)  # v7x option: pl.reciprocal(1+s, approx=True)

    # at = alpha_vec.gather(0, t.long()): alpha where t==0, (1-alpha) where t==1,
    # done arithmetically on the already-loaded t (matches the PyTorch module as written).
    at = alpha + (1.0 - 2.0 * alpha) * t

    # gamma is a Python int -> integer_pow (VPU multiplies, no extra EUP log/exp).
    f_loss = at * (1.0 - pt) ** gamma * bce

    # Reduce only the sublane (row) axis; keep 128 per-lane partial sums resident.
    out_ref[...] += jnp.sum(f_loss, axis=1, keepdims=True)


def weighted_focal_loss(inputs, targets, alpha=0.25, gamma=2):
    """Mean binary focal loss; accepts any shape, reduces over all elements."""
    if float(gamma) == int(gamma):
        gamma = int(gamma)  # keep the pow on the VPU

    x = jnp.reshape(inputs, (-1,))
    # 0/1 targets are exact in bf16 -> halves the second HBM stream.
    t = jnp.reshape(targets, (-1,)).astype(jnp.bfloat16)
    n = x.shape[0]

    # ---- tiling ------------------------------------------------------------
    rows = _cdiv(n, LANES)
    p = _NUM_PARTITIONS
    block_rows = min(_MAX_BLOCK_ROWS, _round_up(max(_cdiv(rows, p), 1), 16))
    steps = _cdiv(rows, p * block_rows)
    rows_per_part = steps * block_rows
    padded_n = p * rows_per_part * LANES

    # Padding contributes exactly 0: bce(x=-1e9, t=0) == 0, (1 - exp(0))**gamma == 0.
    x = jnp.pad(x, (0, padded_n - n), constant_values=_PAD_LOGIT)
    t = jnp.pad(t, (0, padded_n - n), constant_values=0)
    x3 = x.reshape(p, rows_per_part, LANES)
    t3 = t.reshape(p, rows_per_part, LANES)

    kernel = functools.partial(_focal_loss_kernel, alpha=float(alpha), gamma=gamma)

    partials = pl.pallas_call(
        kernel,
        grid=(p, steps),
        in_specs=[
            pl.BlockSpec((1, block_rows, LANES), lambda pi, si: (pi, si, 0)),
            pl.BlockSpec((1, block_rows, LANES), lambda pi, si: (pi, si, 0)),
        ],
        out_specs=pl.BlockSpec((1, 1, LANES), lambda pi, si: (pi, 0, 0)),
        out_shape=jax.ShapeDtypeStruct((p, 1, LANES), jnp.float32),
        compiler_params=pltpu.CompilerParams(
            dimension_semantics=("parallel", "arbitrary")),
    )(x3, t3)

    # Tiny final reduction (p * 128 per-lane partial sums) + mean in the wrapper.
    return jnp.sum(partials) / jnp.float32(n)


def _reference(inputs, targets, alpha=0.25, gamma=2):
    x = jnp.reshape(inputs, (-1,)).astype(jnp.float32)
    t = jnp.reshape(targets, (-1,)).astype(jnp.float32)
    bce = jnp.maximum(x, 0.0) - x * t + jnp.log1p(jnp.exp(-jnp.abs(x)))
    at = jnp.where(t.astype(jnp.int32) == 0, alpha, 1.0 - alpha)
    pt = jnp.exp(-bce)
    return jnp.mean(at * (1.0 - pt) ** gamma * bce)


if __name__ == "__main__":
    key = jax.random.PRNGKey(0)
    k1, k2, k3, k4 = jax.random.split(key, 4)

    # Small 1-D case (the PyTorch module's broadcasting only supports 1-D inputs/targets).
    N = 1024
    logits = jax.random.normal(k1, (N,), dtype=jnp.float32) * 2.0
    targets = jax.random.bernoulli(k2, p=0.3, shape=(N,)).astype(jnp.float32)

    loss = jax.block_until_ready(weighted_focal_loss(logits, targets, alpha=0.25, gamma=2))
    ref = _reference(logits, targets, alpha=0.25, gamma=2)
    assert jnp.allclose(loss, ref, rtol=1e-5, atol=1e-6), (loss, ref)

    # Larger, non-multiple-of-128 case: exercises tail padding and the multi-step
    # accumulator (grid = (2, 2)).
    N2 = 300_000
    logits2 = jax.random.normal(k3, (N2,), dtype=jnp.float32) * 2.0
    targets2 = jax.random.bernoulli(k4, p=0.3, shape=(N2,)).astype(jnp.float32)

    loss2 = jax.block_until_ready(weighted_focal_loss(logits2, targets2, alpha=0.25, gamma=2))
    ref2 = _reference(logits2, targets2, alpha=0.25, gamma=2)
    assert jnp.allclose(loss2, ref2, rtol=1e-4, atol=1e-7), (loss2, ref2)

    print("KERNEL_OK")
</pallas_src>

<mosaic_0001>
module attributes {stable_mosaic.version = 11 : i64} {
  func.func @_focal_loss_kernel(%arg0: i32, %arg1: i32, %arg2: memref<1x16x128xf32, #tpu.memory_space<vmem>>, %arg3: memref<1x16x128xbf16, #tpu.memory_space<vmem>>, %arg4: memref<1x1x128xf32, #tpu.memory_space<vmem>>) attributes {dimension_semantics = [#tpu.dimension_semantics<parallel>, #tpu.dimension_semantics<arbitrary>], iteration_bounds = array<i64: 2, 1>, scalar_prefetch = 0 : i64, scratch_operands = 0 : i64, tpu.core_type = #tpu.core_type<tc>, window_params = [{transform_indices = @transform_0, window_bounds = array<i64: 1, 16, 128>}, {transform_indices = @transform_1, window_bounds = array<i64: 1, 16, 128>}, {transform_indices = @transform_2, window_bounds = array<i64: 1, 1, 128>}]} {
    %c0_i32 = arith.constant 0 : i32
    %0 = arith.cmpi eq, %arg1, %c0_i32 : i32
    %1 = arith.extui %0 : i1 to i32
    %c0_i32_0 = arith.constant 0 : i32
    %2 = arith.cmpi ne, %1, %c0_i32_0 : i32
    scf.if %2 {
      %cst_22 = arith.constant 0.000000e+00 : f32
      %40 = vector.broadcast %cst_22 : f32 to vector<1x1x128xf32>
      %c0_23 = arith.constant 0 : index
      %c0_24 = arith.constant 0 : index
      %c0_25 = arith.constant 0 : index
      %41 = vector.load %arg4[%c0_23, %c0_24, %c0_25] : memref<1x1x128xf32, #tpu.memory_space<vmem>>, vector<1x1x128xf32>
      tpu.vector_store %arg4[%c0_23, %c0_24, %c0_25], %40 {strides = array<i32>} : memref<1x1x128xf32, #tpu.memory_space<vmem>>, vector<1x1x128xf32>,
    } else {
    }
    %c0 = arith.constant 0 : index
    %c0_1 = arith.constant 0 : index
    %c0_2 = arith.constant 0 : index
    %3 = vector.load %arg2[%c0, %c0_1, %c0_2] : memref<1x16x128xf32, #tpu.memory_space<vmem>>, vector<1x16x128xf32>
    %c0_3 = arith.constant 0 : index
    %c0_4 = arith.constant 0 : index
    %c0_5 = arith.constant 0 : index
    %4 = vector.load %arg3[%c0_3, %c0_4, %c0_5] : memref<1x16x128xbf16, #tpu.memory_space<vmem>>, vector<1x16x128xbf16>
    %5 = arith.extf %4 : vector<1x16x128xbf16> to vector<1x16x128xf32>
    %cst = arith.constant 2.000000e+00 : f32
    %6 = vector.broadcast %cst : f32 to vector<1x16x128xf32>
    %7 = arith.mulf %6, %5 : vector<1x16x128xf32>
    %cst_6 = arith.constant 1.000000e+00 : f32
    %8 = vector.broadcast %cst_6 : f32 to vector<1x16x128xf32>
    %9 = arith.subf %8, %7 : vector<1x16x128xf32>
    %10 = arith.mulf %9, %3 : vector<1x16x128xf32>
    %11 = math.absf %3 : vector<1x16x128xf32>
    %cst_7 = arith.constant 0.000000e+00 : f32
    %12 = vector.broadcast %cst_7 : f32 to vector<1x16x128xf32>
    %13 = arith.subf %12, %11 : vector<1x16x128xf32>
    %14 = math.exp %13 : vector<1x16x128xf32>
    %cst_8 = arith.constant 0.000000e+00 : f32
    %15 = vector.broadcast %cst_8 : f32 to vector<1x16x128xf32>
    %16 = arith.maximumf %10, %15 : vector<1x16x128xf32>
    %17 = math.log1p %14 : vector<1x16x128xf32>
    %18 = arith.addf %16, %17 : vector<1x16x128xf32>
    %cst_9 = arith.constant 0.000000e+00 : f32
    %19 = vector.broadcast %cst_9 : f32 to vector<1x16x128xf32>
    %20 = arith.cmpf ogt, %10, %19 : vector<1x16x128xf32>
    %cst_10 = arith.constant 1.000000e+00 : f32
    %21 = vector.broadcast %cst_10 : f32 to vector<1x16x128xf32>
    %22 = arith.select %20, %14, %21 : vector<1x16x128xi1>, vector<1x16x128xf32>
    %cst_11 = arith.constant 1.000000e+00 : f32
    %23 = vector.broadcast %cst_11 : f32 to vector<1x16x128xf32>
    %24 = arith.addf %23, %14 : vector<1x16x128xf32>
    %25 = arith.divf %22, %24 : vector<1x16x128xf32>
    %cst_12 = arith.constant 5.000000e-01 : f32
    %26 = vector.broadcast %cst_12 : f32 to vector<1x16x128xf32>
    %27 = arith.mulf %26, %5 : vector<1x16x128xf32>
    %cst_13 = arith.constant 2.500000e-01 : f32
    %28 = vector.broadcast %cst_13 : f32 to vector<1x16x128xf32>
    %29 = arith.addf %28, %27 : vector<1x16x128xf32>
    %cst_14 = arith.constant 1.000000e+00 : f32
    %30 = vector.broadcast %cst_14 : f32 to vector<1x16x128xf32>
    %31 = arith.subf %30, %25 : vector<1x16x128xf32>
    %32 = arith.mulf %31, %31 : vector<1x16x128xf32>
    %33 = arith.mulf %29, %32 : vector<1x16x128xf32>
    %34 = arith.mulf %33, %18 : vector<1x16x128xf32>
    %c0_15 = arith.constant 0 : index
    %c0_16 = arith.constant 0 : index
    %c0_17 = arith.constant 0 : index
    %35 = vector.load %arg4[%c0_15, %c0_16, %c0_17] : memref<1x1x128xf32, #tpu.memory_space<vmem>>, vector<1x1x128xf32>
    %cst_18 = arith.constant dense<0.000000e+00> : vector<1x128xf32>
    %36 = vector.multi_reduction <add>, %34, %cst_18 [1] : vector<1x16x128xf32> to vector<1x128xf32>
    %37 = vector.shape_cast %36 : vector<1x128xf32> to vector<1x1x128xf32>
    %38 = arith.addf %35, %37 : vector<1x1x128xf32>
    %c0_19 = arith.constant 0 : index
    %c0_20 = arith.constant 0 : index
    %c0_21 = arith.constant 0 : index
    %39 = vector.load %arg4[%c0_19, %c0_20, %c0_21] : memref<1x1x128xf32, #tpu.memory_space<vmem>>, vector<1x1x128xf32>
    tpu.vector_store %arg4[%c0_19, %c0_20, %c0_21], %38 {strides = array<i32>} : memref<1x1x128xf32, #tpu.memory_space<vmem>>, vector<1x1x128xf32>,
    return
  }
  func.func @transform_0(%arg0: i32, %arg1: i32) -> (i32, i32, i32) {
    %c0_i32 = arith.constant 0 : i32
    %c0_i32_0 = arith.constant 0 : i32
    return %arg0, %arg1, %c0_i32 : i32, i32, i32
  }
  func.func @transform_1(%arg0: i32, %arg1: i32) -> (i32, i32, i32) {
    %c0_i32 = arith.constant 0 : i32
    %c0_i32_0 = arith.constant 0 : i32
    return %arg0, %arg1, %c0_i32 : i32, i32, i32
  }
  func.func @transform_2(%arg0: i32, %arg1: i32) -> (i32, i32, i32) {
    %c0_i32 = arith.constant 0 : i32
    %c0_i32_0 = arith.constant 0 : i32
    %c0_i32_1 = arith.constant 0 : i32
    return %arg0, %c0_i32, %c0_i32_0 : i32, i32, i32
  }
}

</mosaic_0001>

<bundles_post_ra>
// kernel: tpu_custom_call.1
= control target key start
LH: loop header
LB: loop body
LE: loop exit
PB: predicated region body
PF: predicated region fallthrough
CT: control target
= control target key end

     0   :  { %7 = vsyncpa [#allocation3], 0  ;;  %s931_s0 = inlined_call_operand.hbm [shape: f32[2,16,128], index: 0, kind: input, shape index: {}]   ;;  %s932_s1 = inlined_call_operand.hbm [shape: bf16[2,16,128], index: 1, kind: input, shape index: {}]   ;;  %s933_s2 = inlined_call_operand.hbm [shape: f32[2,1,128], index: 2, kind: output, shape index: {}]  }
   0x1   :  { %9 = vsyncpa [#allocation3 + $0x1], 0 }
   0x2   :  { %10 = vsyncpa [#allocation6], 0 }
   0x3   :  { %12 = vsyncpa [#allocation6 + $0x1], 0 }
   0x4   :  { %13 = vsyncpa [#allocation4], 0 }
   0x5   :  { %15 = vsyncpa [#allocation4 + $0x1], 0  ;;  %s695_s9 = smov 0   ;;  %s697_s10 = smov 0  }
   0x6   :  { %s699_s11 = smov 0   ;;  %s701_s12 = smov 0  }
   0x7   :  { %s703_s13 = smov 0   ;;  %s705_s14 = smov 0  }
   0x8 LB: > { %s418_s15 = sadd.s32 4294967295, %s670_s14   ;;  %s419_s16 = sadd.s32 4294967294, %s670_s14   ;;  %s670_s14 = sphi %s705_s14, %s21_s14   ;;  %s666_s13 = sphi %s703_s13, %s953_s13   ;;  %s662_s12 = sphi %s701_s12, %s952_s12   ;;  %s658_s11 = sphi %s699_s11, %s951_s11   ;;  %s654_s10 = sphi %s697_s10, %s950_s10   ;;  %s650_s9 = sphi %s695_s9, %s949_s9  }
   0x9   : > { %s33_s17 = sadd.s32 1, %s666_s13  ;;  %s42_s18 = sadd.s32 1, %s658_s11 }
   0xa   : > { %p35_p0 = scmp.ge.s32.totalorder %s33_s17, 2  ;;  %p49_p1 = scmp.ne.s32.totalorder %s658_s11, %s654_s10 }
   0xb   : > { %p50_p2 = scmp.eq.s32.totalorder %s670_s14, 0  ;;  %p55_p3 = scmp.ne.s32.totalorder %s654_s10, %s650_s9 }
   0xc   : > { %s955_s17 = smov (%p35_p0, %s33_s17), 0  ;;  %p56_p5 = scmp.eq.s32.totalorder %s418_s15, 0 }
   0xd   : > { %p736_p4 = por %p50_p2, %p49_p1  ;;  %s37_s20 = ssub.s32 %s666_s13, %s955_s17 }
   0xe   : > { %p107_p6 = scmp.eq.s32.totalorder %s418_s15, 1  ;;  %p40_p7 = scmp.eq.s32.totalorder %s37_s20, 0 }
   0xf   : > { %p742_p8 = por %p56_p5, %p55_p3  ;;  %p113_p10 = scmp.eq.s32.totalorder %s419_s16, 1 }
  0x10   : > { %p746_p9 = por %p107_p6, %p49_p1  ;;  %p457_p13 = scmp.lt.s32.totalorder %s670_s14, 2 }
  0x11   : > { %s937_s21 = scalar_select %p742_p8, 1, 0 }
  0x12   : > { %s938_s22 = scalar_select %p746_p9, 1, 0 }
  0x13   : > { %s751_s23 = scalar_select %p40_p7, %s658_s11, %s42_s18  }
  0x14   : > { %p753_p11 = por %p113_p10, %p55_p3  ;;  %s760_s25 = sand.u32 1, %s658_s11  }
  0x15   : > { %s422_s26 = sshll.u32 %s760_s25, 4  ;;  %s434_s27 = sshll.u32 %s666_s13, 8 }
  0x16   : > { %s939_s24 = scalar_select %p753_p11, 1, 0 }
  0x17   : > { %s767_s30 = scalar_lea.hbm %s931_s0, %s434_s27  ;;  %s137_s3 = scalar_lea.vmem [#allocation2], %s422_s26 }
  0x18   : > { %s146_s4 = sshll.u32 %s137_s3, 4  ;;  %p773_p0 = pnand %p457_p13, %p736_p4  ;;  %s769_s4 = int_to_ptr.vmem [resolvable:$true] %s146_s4 }
  0x19   : > { %s134_s6 = scalar_lea.sflag [#allocation3], %s760_s25  ;;  %s524_s7 = scalar_lea.hbm %s767_s30, 256 }
  0x1a   : > { %p525_p2 = scmp.ne.s32.totalorder %s767_s30, %s524_s7  ;;  %p526_p3 = pneg %p773_p0 }
  0x1b   : > { %s529_s16 = scalar_lea.hbm %s931_s0, 512  ;;  %p530_p4 = scmp.lt.u32.totalorder %s767_s30, %s931_s0 }
  0x1c   : > { %p527_p5 = pnand %p526_p3, %p525_p2  ;;  %p531_p7 = scmp.lt.u32.totalorder %s529_s16, %s524_s7 }
  0x1d   : > { %p533_p13 = scmp.lt.u32.totalorder %s524_s7, %s767_s30 }
  0x1e   : > { %p528_p6 = pneg %p527_p5  ;;  %p532_p10 = por %p531_p7, %p530_p4 }
  0x20   : > { %p534_p12 = por %p533_p13, %p532_p10 }
  0x22   : > { %p535_p1 = pnand %p534_p12, %p528_p6 }
  0x24   : > { %538 = shalt.err (!%p535_p1)
}
  0x25   : > { %s539_s20 = scalar_lea.vmem %s769_s4, 256  ;;  %s672_s26 = smov [#allocation2]  }
  0x26   : > { %p540_p2 = scmp.ne.s32.totalorder %s769_s4, %s539_s20  ;;  %s544_s27 = sshll.u32 %s672_s26, 4  ;;  %s545_s27 = int_to_ptr.vmem [resolvable:$false] %s544_s27 }
  0x27   : > { %s546_s28 = scalar_lea.vmem %s545_s27, 512  ;;  %p547_p9 = scmp.lt.s32.totalorder %s769_s4, %s545_s27 }
  0x28   : > { %p542_p5 = pnand %p540_p2, %p526_p3  ;;  %p548_p4 = scmp.lt.s32.totalorder %s546_s28, %s539_s20 }
  0x2a   : > { %p543_p11 = pneg %p542_p5  ;;  %p549_p7 = por %p548_p4, %p547_p9 }
  0x2c   : > { %p550_p10 = pnand %p549_p7, %p543_p11 }
  0x2e   : > { %553 = shalt.err (!%p550_p10)
}
  0x2f   : > { %s673_s29 = smov 128   ;;  %s674_s3 = smov 8  }
  0x30   : > { %449 = dma.hbm_to_vmem [thread:$0]  (!%p773_p0), %s767_s30, 256, %s769_s4, %s134_s6, %s673_s29, %s673_s29, %s674_s3  }
  0x31   : > { %p177_p12 = scmp.lt.s32.totalorder %s670_s14, 3  ;;  %s425_s7 = sshll.u32 %s760_s25, 3 }
  0x32   : > { %s435_s8 = sshll.u32 %s666_s13, 7  ;;  %p941_p9 = scmp.ge.s32.totalorder %s670_s14, 1 }
  0x33   : > { %s818_s19 = scalar_lea.hbm %s932_s1, %s435_s8  ;;  %s160_s20 = scalar_lea.vmem [#allocation5], %s425_s7 }
  0x34   : > { %p811_p11 = pnand %p941_p9, %p177_p12  ;;  %s169_s26 = sshll.u32 %s160_s20, 4  ;;  %s820_s26 = int_to_ptr.vmem [resolvable:$true] %s169_s26 }
  0x35   : > { %s157_s30 = scalar_lea.sflag [#allocation6], %s760_s25  ;;  %s554_s4 = scalar_lea.hbm %s818_s19, 128 }
  0x36   : > { %p555_p1 = scmp.ne.s32.totalorder %s818_s19, %s554_s4  ;;  %s559_s28 = scalar_lea.hbm %s932_s1, 256 }
  0x37   : > { %p560_p2 = scmp.lt.u32.totalorder %s818_s19, %s932_s1  ;;  %p561_p5 = scmp.lt.u32.totalorder %s559_s28, %s554_s4 }
  0x38   : > { %p557_p6 = pnand %p555_p1, %p526_p3  ;;  %p563_p7 = scmp.lt.u32.totalorder %s554_s4, %s818_s19 }
  0x39   : > { %p562_p4 = por %p561_p5, %p560_p2 }
  0x3a   : > { %p558_p13 = pneg %p557_p6 }
  0x3b   : > { %p564_p10 = por %p563_p7, %p562_p4 }
  0x3d   : > { %p565_p12 = pnand %p564_p10, %p558_p13 }
  0x3f   : > { %568 = shalt.err (!%p565_p12)
}
  0x40   : > { %s569_s7 = scalar_lea.vmem %s820_s26, 128  ;;  %s675_s8 = smov [#allocation5]  }
  0x41   : > { %p570_p9 = scmp.ne.s32.totalorder %s820_s26, %s569_s7  ;;  %s574_s16 = sshll.u32 %s675_s8, 4  ;;  %s575_s16 = int_to_ptr.vmem [resolvable:$false] %s574_s16 }
  0x42   : > { %s576_s18 = scalar_lea.vmem %s575_s16, 256  ;;  %p577_p8 = scmp.lt.s32.totalorder %s820_s26, %s575_s16 }
  0x43   : > { %p572_p1 = pnand %p570_p9, %p526_p3  ;;  %p578_p2 = scmp.lt.s32.totalorder %s576_s18, %s569_s7 }
  0x45   : > { %p573_p6 = pneg %p572_p1  ;;  %p579_p5 = por %p578_p2, %p577_p8 }
  0x47   : > { %p580_p4 = pnand %p579_p5, %p573_p6 }
  0x49   : > { %583 = shalt.err (!%p580_p4)
}
  0x4a   : > { %s676_s20 = smov 64   ;;  %s677_s4 = smov 4  }
  0x4b   : > { %452 = dma.hbm_to_vmem [thread:$0]  (!%p773_p0), %s818_s19, 128, %s820_s26, %s157_s30, %s676_s20, %s676_s20, %s677_s4  }
  0x4c   : > { %181 = sbr.rel (%p811_p11) target bundleno = 161 (0xa1), region = 28  ;;  %s851_s6 = sand.u32 (!%p811_p11), 1, %s654_s10  }
  0x4d   : > { %s429_s27 = sshll.u32 (!%p811_p11), %s851_s6, 4  ;;  %s184_s28 = scalar_lea.sflag (!%p811_p11), [#allocation3], %s851_s6 }
  0x4e   : > { %s187_s29 = scalar_lea.vmem (!%p811_p11), [#allocation2], %s429_s27  ;;  %p943_p8 = scmp.ne.s32.totalorder (!%p811_p11), %s937_s21, 0 }
  0x53   : > { %637 = dma.done.wait (%p943_p8), %s184_s28, 256  }
  0x54   : > { %639 = vsyncadd (%p943_p8), %s184_s28, 4294967040  ;;  %s430_s25 = sshll.u32 %s851_s6, 3  ;;  %s193_s5 = scalar_lea.sflag [#allocation6], %s851_s6 }
  0x55   : > { %s196_s15 = scalar_lea.vmem [#allocation5], %s430_s25 }
  0x56   : > { %641 = dma.done.wait (%p943_p8), %s193_s5, 128  }
  0x57   : > { %643 = vsyncadd (%p943_p8), %s193_s5, 4294967168  ;;  %s866_s19 = scalar_lea.vmem [#allocation7], %s851_s6  ;;  %v678_v0 = vmov 0.0   ;;  %v228_v1 = vld [vmem:[%s187_s29] sm:$0xff]  ;;  %v229_v2 = vld [vmem:[%s187_s29 + $0x8] sm:$0xff]  ;;  %s431_s21 = sshll.u32 %s662_s12, 4 }
  0x58   : > { %227 = vst [vmem:[%s866_s19] sm:$0x1] %v678_v0  ;;  %v240_v3 = vand.u32 2147483647, %v228_v1  ;;  %v241_v4 = vand.u32 2147483647, %v229_v2  ;;  %v437_v9 = vld [vmem:[%s196_s15] sm:$0xff]   ;;  %s881_s7 = scalar_lea.hbm %s933_s2, %s431_s21 }
  0x59   : > { %v438_v10 = vunpack.c.l.bf16 %v437_v9  ;;  %v439_v11 = vunpack.c.h.bf16 %v437_v9  ;;  %s315_s26 = sshll.u32 %s866_s19, 4  ;;  %s303_s8 = scalar_lea.sflag [#allocation4], %s851_s6  ;;  %s883_s26 = int_to_ptr.vmem [resolvable:$true] %s315_s26 }
  0x5a   : > { %v242_v5 = vsub.f32 0.0, %v240_v3  ;;  %v243_v6 = vsub.f32 0.0, %v241_v4  ;;  %s584_s16 = scalar_lea.vmem %s883_s26, 16  ;;  %p946_p3 = scmp.ne.s32.totalorder %s938_s22, 0 }
  0x5b   : > { %v234_v12 = vmul.f32 2.0, %v438_v10  ;;  %v235_v13 = vmul.f32 2.0, %v439_v11  ;;  %v280_v31 = vmul.f32 0.5, %v438_v10  ;;  %v281_v39 = vmul.f32 0.5, %v439_v11  ;;  %p585_p0 = scmp.ne.s32.totalorder %s883_s26, %s584_s16  ;;  %s679_s12 = smov [#allocation7]  }
  0x5c   : > { %v244_v7 = vmul.f32 1.442695, %v242_v5  ;;  %v246_v8 = vmul.f32 1.442695, %v243_v6  ;;  %s588_s18 = sshll.u32 %s679_s12, 4  ;;  %s589_s18 = int_to_ptr.vmem [resolvable:$false] %s588_s18 }
  0x5d   : > { %v236_v17 = vsub.f32 1.0, %v234_v12  ;;  %v237_v19 = vsub.f32 1.0, %v235_v13  ;;  %v282_v47 = vadd.f32 0.25, %v280_v31  ;;  %v283_v49 = vadd.f32 0.25, %v281_v39  ;;  %p586_p11 = pnand %p585_p0, %p946_p3  ;;  %s590_s20 = scalar_lea.vmem %s589_s18, 32 }
  0x5e   : > { %512 = vpow2.f32 %v244_v7  ;;  %p591_p7 = scmp.lt.s32.totalorder %s883_s26, %s589_s18  ;;  %p592_p10 = scmp.lt.s32.totalorder %s590_s20, %s584_s16 }
  0x5f   : > { %514 = vpow2.f32 %v246_v8  ;;  %v238_v21 = vmul.f32 %v236_v17, %v228_v1  ;;  %v239_v23 = vmul.f32 %v237_v19, %v229_v2  ;;  %v292_v1 = vld [vmem:[%s866_s19] sm:$0x1]  ;;  %p587_p13 = pneg %p586_p11 }
  0x60   : > { %p593_p12 = por %p592_p10, %p591_p7 }
  0x61   : > { %vm270_vm0 = vcmp.gt.f32.partialorder %v238_v21, 0.0  ;;  %vm271_vm1 = vcmp.gt.f32.partialorder %v239_v23, 0.0  ;;  %v248_v41 = vmax.f32 %v238_v21, 0.0  ;;  %v249_v43 = vmax.f32 %v239_v23, 0.0 }
  0x62   : > { %p594_p9 = pnand %p593_p12, %p587_p13 }
  0x68   : > { %v513_v14 = vpop.eup %512 }
  0x69   : > { %v515_v15 = vpop.eup %514  ;;  %v250_v16 = vadd.f32 1.0, %v513_v14  ;;  %v253_v20 = vmul.f32 -0.5, %v513_v14  ;;  %v256_v25 = vand.u32 2147483647, %v513_v14  ;;  %v272_v30 = vsel %vm270_vm0, %v513_v14, 1.0 }
  0x6a   : > { %v259_v18 = vadd.f32 1.0, %v515_v15  ;;  %v262_v22 = vmul.f32 -0.5, %v515_v15  ;;  %v265_v27 = vand.u32 2147483647, %v515_v15  ;;  %v273_v36 = vsel %vm271_vm1, %v515_v15, 1.0 }
  0x6b   : > { %516 = vlog2.f32 %v250_v16  ;;  %v254_v24 = vadd.f32 1.0, %v253_v20  ;;  %vm869_vm2 = vcmp.lt.f32.partialorder %v256_v25, 0.0004427343 }
  0x6c   : > { %518 = vlog2.f32 %v259_v18  ;;  %v263_v26 = vadd.f32 1.0, %v262_v22  ;;  %vm266_vm3 = vcmp.lt.f32.partialorder %v265_v27, 0.0004427343 }
  0x6d   : > { %520 = vrcp.f32 %v250_v16  ;;  %v255_v29 = vmul.f32 %v513_v14, %v254_v24 }
  0x6e   : > { %522 = vrcp.f32 %v259_v18  ;;  %v264_v35 = vmul.f32 %v515_v15, %v263_v26 }
  0x75   : > { %v517_v28 = vpop.eup %516 }
  0x76   : > { %v519_v32 = vpop.eup %518  ;;  %v252_v33 = vmul.f32 0.6931472, %v517_v28 }
  0x77   : > { %v521_v37 = vpop.eup %520  ;;  %v261_v38 = vmul.f32 0.6931472, %v519_v32 }
  0x78   : > { %v523_v40 = vpop.eup %522  ;;  %v277_v42 = vmul.f32 %v521_v37, %v272_v30  ;;  %v258_v44 = vsel %vm869_vm2, %v255_v29, %v252_v33 }
  0x79   : > { %v279_v45 = vmul.f32 %v523_v40, %v273_v36  ;;  %v267_v46 = vsel %vm266_vm3, %v264_v35, %v261_v38  ;;  %v268_v51 = vadd.f32 %v258_v44, %v248_v41 }
  0x7a   : > { %v284_v48 = vsub.f32 1.0, %v277_v42  ;;  %v269_v53 = vadd.f32 %v267_v46, %v249_v43 }
  0x7b   : > { %v285_v50 = vsub.f32 1.0, %v279_v45 }
  0x7c   : > { %v286_v52 = vmul.f32 %v284_v48, %v284_v48 }
  0x7d   : > { %v287_v54 = vmul.f32 %v285_v50, %v285_v50 }
  0x7e   : > { %v288_v55 = vmul.f32 %v286_v52, %v282_v47 }
  0x7f   : > { %v289_v56 = vmul.f32 %v287_v54, %v283_v49 }
  0x80   : > { %v290_v57 = vmul.f32 %v288_v55, %v268_v51 }
  0x81   : > { %v291_v58 = vmul.f32 %v289_v56, %v269_v53 }
  0x83   : > { %v293_v59 = vadd.f32 %v291_v58, %v290_v57 }
  0x85   : > { %v294_v60 = vrot.slane %v293_v59, 4 }
  0x87   : > { %v295_v61 = vadd.f32 %v294_v60, %v293_v59 }
  0x89   : > { %v296_v62 = vrot.slane %v295_v61, 2 }
  0x8b   : > { %v297_v63 = vadd.f32 %v296_v62, %v295_v61 }
  0x8d   : > { %v298_v0 = vrot.slane %v297_v63, 1 }
  0x8f   : > { %v299_v2 = vadd.f32 %v298_v0, %v297_v63 }
  0x91   : > { %v300_v3 = vadd.f32 %v299_v2, %v292_v1 }
  0x93   : > { %301 = vst [vmem:[%s866_s19] sm:$0x1] %v300_v3 }
  0x94   : > { %597 = shalt.err (!%p594_p9)
}
  0x95   : > { %s598_s4 = scalar_lea.hbm %s881_s7, 16  ;;  %s602_s28 = scalar_lea.hbm %s933_s2, 32 }
  0x96   : > { %p599_p1 = scmp.ne.s32.totalorder %s881_s7, %s598_s4  ;;  %p603_p5 = scmp.lt.u32.totalorder %s881_s7, %s933_s2 }
  0x97   : > { %p604_p4 = scmp.lt.u32.totalorder %s602_s28, %s598_s4  ;;  %p606_p0 = scmp.lt.u32.totalorder %s598_s4, %s881_s7 }
  0x98   : > { %p600_p6 = pnand %p599_p1, %p946_p3 }
  0x99   : > { %p605_p8 = por %p604_p4, %p603_p5 }
  0x9a   : > { %p601_p2 = pneg %p600_p6 }
  0x9b   : > { %p607_p11 = por %p606_p0, %p605_p8 }
  0x9d   : > { %p608_p13 = pnand %p607_p11, %p601_p2 }
  0x9f   : > { %611 = shalt.err (!%p608_p13)
}
  0xa0   : > { %444 = dma.vmem_to_hbm [thread:$0]  (%p946_p3), %s883_s26, 16, %s881_s7, %s303_s8  }
  0xa1 PF: > { %s327_s5 = sand.u32 1, %s650_s9   ;;  %p947_p7 = scmp.ne.s32.totalorder %s939_s24, 0 }
  0xa2   : > { %p948_p10 = scmp.ge.s32.totalorder %s670_s14, 2  ;;  %s328_s15 = scalar_lea.sflag [#allocation4], %s327_s5 }
  0xa4   : > { %p454_p12 = pnand %p948_p10, %p947_p7 }
  0xa6   : > { %645 = dma.done.wait (!%p454_p12), %s328_s15, 16  }
  0xa7   : > { %647 = vsyncadd (!%p454_p12), %s328_s15, 4294967280  ;;  %s21_s14 = sadd.s32 1, %s670_s14   ;;  %s949_s9 = smov %s654_s10 }
  0xa8   : > { %p18_p9 = scmp.ge.s32.totalorder %s21_s14, 4   ;;  %s950_s10 = smov %s658_s11 }
  0xa9   : > { %s951_s11 = smov %s751_s23  ;;  %s952_s12 = smov %s666_s13 }
  0xaa   : > { %s953_s13 = smov %s955_s17  ;;  %20 = sbr.rel (!%p18_p9) target bundleno = 8 (0x8), region = 90 }
  0xb1   :  { %332 = vsyncpa [#allocation3], 1 }
  0xb2   :  { %334 = vsyncpa [#allocation3 + $0x1], 1 }
  0xb3   :  { %335 = vsyncpa [#allocation6], 1 }
  0xb4   :  { %337 = vsyncpa [#allocation6 + $0x1], 1 }
  0xb5   :  { %338 = vsyncpa [#allocation4], 1 }
  0xb6   :  { %340 = vsyncpa [#allocation4 + $0x1], 1 }

</bundles_post_ra>
